<compile_context>
chip_gen: v6e
topology: v6e:2x2x1
jax: 0.10.0
libtpu: 0.0.40
codegen_flags: <defaults>
</compile_context>

<pallas_src>
import jax
import jax.numpy as jnp
from jax.experimental import pallas as pl
from jax.experimental.pallas import tpu as pltpu

LANE = 128
BLOCK_BYTES = 4 << 20          # ~4 MiB per block, dtype-aware row count below
VMEM_LIMIT_BYTES = 40 << 20    # 4 blocks x 4 MiB double-buffered = 16 MiB << 40 MiB


def _round_up(a, b):
    return -(-a // b) * b


def _round_down(a, b):
    return (a // b) * b


def _quant_kernel(scale_ref, x_ref, o_ref):
    # scale_ref: (1, 1) f32 scalar in SMEM (same block every grid step).
    # x_ref / o_ref: (block_rows, 128) tiles in VMEM, native dtype.
    s = scale_ref[0, 0]
    # In-kernel f32 divide (NOT reciprocal-multiply): exact quotient semantics
    # so trunc() matches torch's trunc(x / scale) for arbitrary scales.
    v = x_ref[...].astype(jnp.float32) / s
    # trunc(v) == floor(v * sign(v)) * sign(v): round toward zero, trunc(0)=0.
    o_ref[...] = jnp.trunc(v).astype(o_ref.dtype)


def _quant_2d(x2d, scale_arr, donate=False):
    """Run the Pallas kernel over a lane-dense (rows, 128) slab."""
    rows = x2d.shape[0]
    itemsize = jnp.dtype(x2d.dtype).itemsize
    # Sublane granularity: 8 rows for f32, 16 for bf16, 32 for int8/fp8.
    sub = 8 * (4 // itemsize)

    # Dtype-aware block sizing from a byte budget (keeps bf16 at the same
    # ~4 MiB per-step DMA as f32 instead of half of it).
    block_rows_cap = max(sub, _round_down(BLOCK_BYTES // (LANE * itemsize), sub))

    if rows <= block_rows_cap:
        if rows >= 2 * sub:
            # Split into (at least) 2 blocks so both of v7x's TensorCores run.
            block_rows = _round_up(_round_up(rows, 2) // 2, sub)
        else:
            block_rows = rows           # tiny: single full-extent block
    else:
        block_rows = block_rows_cap

    grid = (pl.cdiv(rows, block_rows),)  # ragged last block masked by Pallas

    kwargs = {}
    if donate:
        # Input index 1 is the tensor (index 0 is the SMEM scalar).
        kwargs["input_output_aliases"] = {1: 0}

    return pl.pallas_call(
        _quant_kernel,
        out_shape=jax.ShapeDtypeStruct((rows, LANE), x2d.dtype),
        grid=grid,
        in_specs=[
            pl.BlockSpec((1, 1), lambda i: (0, 0),
                         memory_space=pltpu.MemorySpace.SMEM),
            pl.BlockSpec((block_rows, LANE), lambda i: (i, 0)),
        ],
        out_specs=pl.BlockSpec((block_rows, LANE), lambda i: (i, 0)),
        compiler_params=pltpu.CompilerParams(
            dimension_semantics=("parallel",),
            vmem_limit_bytes=VMEM_LIMIT_BYTES,
        ),
        **kwargs,
    )(scale_arr, x2d)


def quant(x, scale, *, donate=False):
    """Elementwise truncate-toward-zero of x / scale (forward of `Quant`).

    x:      any-shape float array (NCHW expected from the PyTorch side)
    scale:  python float or scalar array
    donate: if the caller can donate x, alias the output onto the input buffer
    """
    # TODO(synk): backward (straight-through gradient of RoundNoGradient) is
    # not implemented here; wrap with jax.custom_vjp if used in training.
    orig_shape = x.shape
    n = x.size
    flat = x.reshape(-1)
    scale_arr = jnp.asarray(scale, dtype=jnp.float32).reshape(1, 1)

    rem = n % LANE
    n_main = n - rem

    if rem == 0:
        out2d = _quant_2d(flat.reshape(n // LANE, LANE), scale_arr, donate=donate)
        return out2d.reshape(orig_shape)

    # Ragged path: kernel over the multiple-of-128 prefix; trivial jnp math for
    # the <=127-element tail.  Only extra HBM pass is the final concatenate
    # (vs. the old pad-whole-array + slice-whole-array round trips).
    parts = []
    if n_main:
        main = flat[:n_main].reshape(n_main // LANE, LANE)
        parts.append(_quant_2d(main, scale_arr, donate=False).reshape(-1))
    tail = flat[n_main:]
    tail_out = jnp.trunc(tail.astype(jnp.float32) / scale_arr[0, 0]).astype(x.dtype)
    parts.append(tail_out)
    out = jnp.concatenate(parts) if len(parts) > 1 else parts[0]
    return out.reshape(orig_shape)


def _quant_ref(x, scale):
    v = x.astype(jnp.float32) / jnp.float32(scale)
    s = jnp.sign(v)
    return (jnp.floor(v * s) * s).astype(x.dtype)


if __name__ == "__main__":
    key = jax.random.PRNGKey(0)
    k1, k2, k3, k4 = jax.random.split(key, 4)

    # 1) f32 NCHW activation tensor, power-of-two scale (primary case).
    x = jax.random.normal(k1, (2, 4, 16, 16), dtype=jnp.float32) * 5.0
    out = jax.block_until_ready(quant(x, 0.25))
    ref = _quant_ref(x, 0.25)
    assert out.shape == x.shape and out.dtype == x.dtype
    assert jnp.array_equal(out, ref), "f32 mismatch vs reference"

    # 2) non-power-of-two scale — exercises the exact in-kernel divide.
    out2 = jax.block_until_ready(quant(x, 0.3))
    ref2 = _quant_ref(x, 0.3)
    assert jnp.array_equal(out2, ref2), "non-pow2-scale mismatch vs reference"

    # 3) bf16 tensor — native-dtype HBM path, dtype-aware block sizing.
    xb = (jax.random.normal(k2, (2, 4, 16, 16), dtype=jnp.float32) * 5.0
          ).astype(jnp.bfloat16)
    outb = jax.block_until_ready(quant(xb, 0.5))
    refb = _quant_ref(xb, 0.5)
    assert outb.dtype == jnp.bfloat16
    assert jnp.array_equal(outb, refb), "bf16 mismatch vs reference"

    # 4) ragged size with a multiple-of-128 prefix + <128 tail.
    xr = jax.random.normal(k3, (3, 5, 113), dtype=jnp.float32) * 3.0
    outr = jax.block_until_ready(quant(xr, 0.25))
    refr = _quant_ref(xr, 0.25)
    assert outr.shape == xr.shape
    assert jnp.array_equal(outr, refr), "ragged mismatch vs reference"

    # 5) tiny ragged size (< 128 elements): pure tail path.
    xt = jax.random.normal(k4, (3, 5, 7), dtype=jnp.float32) * 3.0
    outt = jax.block_until_ready(quant(xt, 0.3))
    reft = _quant_ref(xt, 0.3)
    assert jnp.array_equal(outt, reft), "tiny-ragged mismatch vs reference"

    print("KERNEL_OK")
</pallas_src>

<mosaic_0001>
module attributes {stable_mosaic.version = 11 : i64} {
  func.func @_quant_kernel(%arg0: i32, %arg1: memref<1x1xf32, #tpu.memory_space<smem>>, %arg2: memref<8x128xf32, #tpu.memory_space<vmem>>, %arg3: memref<8x128xf32, #tpu.memory_space<vmem>>) attributes {dimension_semantics = [#tpu.dimension_semantics<parallel>], iteration_bounds = array<i64: 2>, scalar_prefetch = 0 : i64, scratch_operands = 0 : i64, tpu.core_type = #tpu.core_type<tc>, window_params = [{transform_indices = @transform_0, window_bounds = array<i64: 1, 1>}, {transform_indices = @transform_1, window_bounds = array<i64: 8, 128>}, {transform_indices = @transform_2, window_bounds = array<i64: 8, 128>}]} {
    %c0 = arith.constant 0 : index
    %c0_0 = arith.constant 0 : index
    %0 = memref.load %arg1[%c0, %c0_0] : memref<1x1xf32, #tpu.memory_space<smem>>
    %c0_1 = arith.constant 0 : index
    %c0_2 = arith.constant 0 : index
    %1 = vector.load %arg2[%c0_1, %c0_2] : memref<8x128xf32, #tpu.memory_space<vmem>>, vector<8x128xf32>
    %2 = vector.broadcast %0 : f32 to vector<8x128xf32>
    %3 = arith.divf %1, %2 : vector<8x128xf32>
    %cst = arith.constant 0.000000e+00 : f32
    %4 = vector.broadcast %cst : f32 to vector<8x128xf32>
    %5 = arith.cmpf olt, %3, %4 : vector<8x128xf32>
    %6 = math.ceil %3 : vector<8x128xf32>
    %7 = math.floor %3 : vector<8x128xf32>
    %8 = arith.select %5, %6, %7 : vector<8x128xi1>, vector<8x128xf32>
    %c0_3 = arith.constant 0 : index
    %c0_4 = arith.constant 0 : index
    %9 = vector.load %arg3[%c0_3, %c0_4] : memref<8x128xf32, #tpu.memory_space<vmem>>, vector<8x128xf32>
    tpu.vector_store %arg3[%c0_3, %c0_4], %8 {strides = array<i32>} : memref<8x128xf32, #tpu.memory_space<vmem>>, vector<8x128xf32>,
    return
  }
  func.func @transform_0(%arg0: i32) -> (i32, i32) {
    %c0_i32 = arith.constant 0 : i32
    %c0_i32_0 = arith.constant 0 : i32
    %c0_i32_1 = arith.constant 0 : i32
    return %c0_i32, %c0_i32_0 : i32, i32
  }
  func.func @transform_1(%arg0: i32) -> (i32, i32) {
    %c0_i32 = arith.constant 0 : i32
    %c0_i32_0 = arith.constant 0 : i32
    return %arg0, %c0_i32 : i32, i32
  }
  func.func @transform_2(%arg0: i32) -> (i32, i32) {
    %c0_i32 = arith.constant 0 : i32
    %c0_i32_0 = arith.constant 0 : i32
    return %arg0, %c0_i32 : i32, i32
  }
}

</mosaic_0001>

<bundles_post_ra>
// kernel: tpu_custom_call.1
= control target key start
LH: loop header
LB: loop body
LE: loop exit
PB: predicated region body
PF: predicated region fallthrough
CT: control target
= control target key end

     0   :  { %s575_s0 = inlined_call_operand.<no memory space> [shape: f32[1,1], index: 0, kind: input, shape index: {}]   ;;  %s576_s1 = inlined_call_operand.hbm [shape: f32[16,128], index: 1, kind: input, shape index: {}]   ;;  %s577_s2 = inlined_call_operand.hbm [shape: f32[16,128], index: 2, kind: output, shape index: {}]  }
   0x1   :  { %7 = sst [smem:[#allocation2]] %s575_s0 }
   0x2   :  { %8 = vsyncpa [#allocation4], 0 }
   0x3   :  { %10 = vsyncpa [#allocation4 + $0x1], 0 }
   0x4   :  { %11 = vsyncpa [#allocation5], 0 }
   0x5   :  { %13 = vsyncpa [#allocation5 + $0x1], 0  ;;  %s428_s11 = smov 0   ;;  %s430_s12 = smov 0  }
   0x6   :  { %s432_s13 = smov 0   ;;  %s434_s14 = smov 0  }
   0x7 LB: > { %s449_s0 = sadd.s32 4294967295, %s406_s14   ;;  %s254_s15 = sadd.s32 4294967294, %s406_s14   ;;  %s406_s14 = sphi %s434_s14, %s594_s14   ;;  %s402_s13 = sphi %s432_s13, %s593_s13   ;;  %s398_s12 = sphi %s430_s12, %s592_s12   ;;  %s394_s11 = sphi %s428_s11, %s591_s11  }
   0x8   : > { %s453_s16 = sadd.s32 1, %s406_s14   ;;  %s47_s17 = sadd.s32 1, %s402_s13 }
   0x9   : > { %s44_s18 = ssub.s32 %s406_s14, %s453_s16  ;;  %p54_p0 = scmp.ne.s32.totalorder %s402_s13, %s398_s12 }
   0xa   : > { %p45_p1 = scmp.eq.s32.totalorder %s44_s18, 0  ;;  %p55_p2 = scmp.eq.s32.totalorder %s406_s14, 0 }
   0xb   : > { %p60_p3 = scmp.ne.s32.totalorder %s398_s12, %s394_s11  ;;  %p61_p4 = scmp.eq.s32.totalorder %s449_s0, 0 }
   0xc   : > { %s465_s19 = scalar_select %p45_p1, %s402_s13, %s47_s17  }
   0xd   : > { %p467_p5 = por %p55_p2, %p54_p0  ;;  %p471_p6 = por %p61_p4, %p60_p3 }
   0xe   : > { %p84_p7 = scmp.eq.s32.totalorder %s449_s0, 1  ;;  %p90_p8 = scmp.eq.s32.totalorder %s254_s15, 1 }
   0xf   : > { %s581_s21 = scalar_select %p471_p6, 1, 0 }
  0x10   : > { %p278_p10 = scmp.lt.s32.totalorder %s406_s14, 2  ;;  %p478_p11 = por %p84_p7, %p54_p0 }
  0x11   : > { %p482_p12 = por %p90_p8, %p60_p3  ;;  %s113_s24 = sand.u32 1, %s402_s13  }
  0x12   : > { %s582_s22 = scalar_select %p478_p11, 1, 0 }
  0x13   : > { %s583_s23 = scalar_select %p482_p12, 1, 0 }
  0x14   : > { %s258_s25 = sshll.u32 %s406_s14, 7  ;;  %s257_s26 = sshll.u32 %s113_s24, 3 }
  0x15   : > { %s491_s29 = scalar_lea.hbm %s576_s1, %s258_s25  ;;  %s117_s30 = scalar_lea.vmem [#allocation3], %s257_s26 }
  0x16   : > { %s124_s3 = sshll.u32 %s117_s30, 4  ;;  %p495_p13 = pnand %p278_p10, %p467_p5  ;;  %s499_s3 = int_to_ptr.vmem [resolvable:$true] %s124_s3 }
  0x17   : > { %s114_s5 = scalar_lea.sflag [#allocation4], %s113_s24  ;;  %s314_s6 = scalar_lea.hbm %s491_s29, 128 }
  0x18   : > { %p315_p2 = scmp.ne.s32.totalorder %s491_s29, %s314_s6  ;;  %p316_p3 = pneg %p495_p13 }
  0x19   : > { %s319_s9 = scalar_lea.hbm %s576_s1, 256  ;;  %p320_p5 = scmp.lt.s32.totalorder %s491_s29, %s576_s1 }
  0x1a   : > { %p317_p4 = pnand %p316_p3, %p315_p2  ;;  %p321_p8 = scmp.lt.s32.totalorder %s319_s9, %s314_s6 }
  0x1c   : > { %p318_p7 = pneg %p317_p4  ;;  %p322_p10 = por %p321_p8, %p320_p5 }
  0x1e   : > { %p323_p9 = pnand %p322_p10, %p318_p7 }
  0x20   : > { %326 = shalt.err (!%p323_p9)
}
  0x21   : > { %s327_s17 = scalar_lea.vmem %s499_s3, 128  ;;  %s408_s18 = smov [#allocation3]  }
  0x22   : > { %p328_p0 = scmp.ne.s32.totalorder %s499_s3, %s327_s17  ;;  %s332_s20 = sshll.u32 %s408_s18, 4  ;;  %s333_s20 = int_to_ptr.vmem [resolvable:$false] %s332_s20 }
  0x23   : > { %s334_s24 = scalar_lea.vmem %s333_s20, 256  ;;  %p335_p4 = scmp.lt.s32.totalorder %s499_s3, %s333_s20 }
  0x24   : > { %p330_p1 = pnand %p328_p0, %p316_p3  ;;  %p336_p12 = scmp.lt.s32.totalorder %s334_s24, %s327_s17 }
  0x26   : > { %p331_p2 = pneg %p330_p1  ;;  %p337_p11 = por %p336_p12, %p335_p4 }
  0x28   : > { %p338_p6 = pnand %p337_p11, %p331_p2 }
  0x2a   : > { %341 = shalt.err (!%p338_p6)
}
  0x2b   : > { %273 = dma.hbm_to_vmem [thread:$0]  (!%p495_p13), %s491_s29, 128, %s499_s3, %s114_s5  }
  0x2c   : > { %p585_p9 = scmp.lt.s32.totalorder %s406_s14, 3  ;;  %p586_p7 = scmp.ge.s32.totalorder %s406_s14, 1 }
  0x2e   : > { %p130_p0 = pnand %p586_p7, %p585_p9 }
  0x2f   : > { %s526_s25 = sand.u32 (!%p130_p0), 1, %s398_s12   ;;  %p587_p6 = scmp.ne.s32.totalorder (!%p130_p0), %s581_s21, 0 }
  0x30   : > { %133 = sbr.rel (%p130_p0) target bundleno = 93 (0x5d), region = 28  ;;  %s260_s26 = sshll.u32 (!%p130_p0), %s526_s25, 3 }
  0x31   : > { %s136_s27 = scalar_lea.sflag (!%p130_p0), [#allocation4], %s526_s25  ;;  %s139_s28 = scalar_lea.vmem (!%p130_p0), [#allocation3], %s260_s26 }
  0x35   : > { %385 = dma.done.wait (%p587_p6), %s136_s27, 128  }
  0x36   : > { %387 = vsyncadd (%p587_p6), %s136_s27, 4294967168  ;;  %s160_s29 = sld [smem:[#allocation2]]  ;;  %v161_v1 = vld [vmem:[%s139_s28] sm:$0xff]  ;;  %s159_s30 = scalar_lea.vmem [#allocation6], %s260_s26 }
  0x37   : > { %s184_s3 = sshll.u32 %s159_s30, 4  ;;  %s263_s4 = sshll.u32 %s449_s0, 7  ;;  %s535_s3 = int_to_ptr.vmem [resolvable:$true] %s184_s3 }
  0x38   : > { %s182_s6 = scalar_lea.hbm %s577_s2, %s263_s4  ;;  %s171_s7 = scalar_lea.sflag [#allocation5], %s526_s25 }
  0x39   : > { %s342_s8 = scalar_lea.vmem %s535_s3, 128  ;;  %p588_p12 = scmp.ne.s32.totalorder %s582_s22, 0 }
  0x3a   : > { %p343_p11 = scmp.ne.s32.totalorder %s535_s3, %s342_s8  ;;  %s409_s0 = smov [#allocation6]  }
  0x3b   : > { %s346_s9 = sshll.u32 %s409_s0, 4  ;;  %s347_s9 = int_to_ptr.vmem [resolvable:$false] %s346_s9 }
  0x3c   : > { %v162_v0 = vstv %s160_s29  ;;  %p344_p13 = pnand %p343_p11, %p588_p12  ;;  %s348_s10 = scalar_lea.vmem %s347_s9, 256 }
  0x3d   : > { %312 = vrcp.f32 %v162_v0  ;;  %p349_p3 = scmp.lt.s32.totalorder %s535_s3, %s347_s9  ;;  %p350_p5 = scmp.lt.s32.totalorder %s348_s10, %s342_s8 }
  0x3e   : > { %p345_p1 = pneg %p344_p13 }
  0x3f   : > { %p351_p8 = por %p350_p5, %p349_p3 }
  0x41   : > { %p352_p10 = pnand %p351_p8, %p345_p1 }
  0x4a   : > { %v313_v2 = vpop.eup %312 }
  0x4b   : > { %v164_v3 = vmul.f32 %v313_v2, %v161_v1 }
  0x4d   : > { %vm165_vm0 = vcmp.lt.f32.partialorder %v164_v3, 0.0  ;;  %v166_v4 = vceil.f32 %v164_v3  ;;  %v167_v5 = vfloor.f32 %v164_v3 }
  0x4f   : > { %v168_v6 = vsel %vm165_vm0, %v166_v4, %v167_v5 }
  0x50   : > { %169 = vst [vmem:[%s159_s30] sm:$0xff] %v168_v6 }
  0x51   : > { %355 = shalt.err (!%p352_p10)
}
  0x52   : > { %s356_s15 = scalar_lea.hbm %s182_s6, 128  ;;  %s360_s20 = scalar_lea.hbm %s577_s2, 256 }
  0x53   : > { %p357_p2 = scmp.ne.s32.totalorder %s182_s6, %s356_s15  ;;  %p361_p7 = scmp.lt.s32.totalorder %s182_s6, %s577_s2 }
  0x54   : > { %p362_p0 = scmp.lt.s32.totalorder %s360_s20, %s356_s15 }
  0x55   : > { %p358_p4 = pnand %p357_p2, %p588_p12 }
  0x56   : > { %p363_p6 = por %p362_p0, %p361_p7 }
  0x57   : > { %p359_p9 = pneg %p358_p4 }
  0x59   : > { %p364_p11 = pnand %p363_p6, %p359_p9 }
  0x5b   : > { %367 = shalt.err (!%p364_p11)
}
  0x5c   : > { %268 = dma.vmem_to_hbm [thread:$0]  (%p588_p12), %s535_s3, 128, %s182_s6, %s171_s7  }
  0x5d PF: > { %s196_s26 = sand.u32 1, %s394_s11   ;;  %p589_p13 = scmp.ne.s32.totalorder %s583_s23, 0 }
  0x5e   : > { %p590_p1 = scmp.ge.s32.totalorder %s406_s14, 2  ;;  %s197_s27 = scalar_lea.sflag [#allocation5], %s196_s26 }
  0x60   : > { %p275_p3 = pnand %p590_p1, %p589_p13 }
  0x62   : > { %p276_p5 = pneg %p275_p3 }
  0x64   : > { %389 = dma.done.wait (%p276_p5), %s197_s27, 128  }
  0x65   : > { %391 = vsyncadd (%p276_p5), %s197_s27, 4294967168  ;;  %p16_p8 = scmp.ge.s32.totalorder %s453_s16, 4   ;;  %s591_s11 = smov %s398_s12 }
  0x66   : > { %s592_s12 = smov %s402_s13  ;;  %s593_s13 = smov %s465_s19 }
  0x67   : > { %s594_s14 = smov %s453_s16  ;;  %18 = sbr.rel (!%p16_p8) target bundleno = 7 (0x7), region = 73 }
  0x6c   :  { %202 = vsyncpa [#allocation4], 1 }
  0x6d   :  { %204 = vsyncpa [#allocation4 + $0x1], 1 }
  0x6e   :  { %205 = vsyncpa [#allocation5], 1 }
  0x6f   :  { %207 = vsyncpa [#allocation5 + $0x1], 1 }

</bundles_post_ra>
